<compile_context>
chip_gen: v7x
topology: tpu7x:2x2x1
jax: 0.10.0
libtpu: 0.0.40
codegen_flags: <defaults>
</compile_context>

<pallas_src>
import math

import jax
import jax.numpy as jnp
from jax import lax
from jax.experimental import pallas as pl
from jax.experimental.pallas import tpu as pltpu


def _round_up(x, m):
    return ((x + m - 1) // m) * m


def _vmem_capacity_bytes():
    try:
        return int(pltpu.get_tpu_info().vmem_capacity_bytes)
    except Exception:
        return 64 << 20  # conservative: v7x per-TensorCore VMEM


def _prediction_kernel(x_ref, w_ref, b_ref, o_ref):
    # x_ref: (TN, H) native activation dtype (cast per-tile, in VMEM, off the HBM path)
    # w_ref: (C, H)  weight_norm-folded weight (compute dtype)
    # b_ref: (C, 1)  f32 bias
    # o_ref: (C, TN) transposed, lane-dense output tile
    xt = x_ref[...].astype(w_ref.dtype)
    yt = lax.dot_general(
        w_ref[...], xt,
        dimension_numbers=(((1,), (1,)), ((), ())),   # contract H with H, no transpose op
        preferred_element_type=jnp.float32,
    )                                                  # (C, TN), f32 accumulate on the MXU
    o_ref[...] = (yt + b_ref[...]).astype(o_ref.dtype)


def prediction_forward(x, v, g, b, *, compute_dtype=None):
    """x: (..., hidden). v: (C, hidden), g: (C,), b: (C,). Returns (..., C)."""
    orig_shape = x.shape
    hidden = orig_shape[-1]
    num_classes = v.shape[0]
    out_dtype = x.dtype
    if compute_dtype is None:
        # Use the activation's own dtype for the MXU operands: bf16 activations get the
        # 2x HBM-bandwidth win for free; f32 activations keep full precision.
        compute_dtype = x.dtype

    x2 = x.reshape(-1, hidden)        # collapse leading dims (free); NO pad, NO astype
    n_rows = x2.shape[0]

    # Fold the weight_norm scale into the weight once (f32 math, tiny C x H array).
    v32 = v.astype(jnp.float32)
    scale = g.astype(jnp.float32)[:, None] * lax.rsqrt(
        jnp.sum(v32 * v32, axis=1, keepdims=True))
    w_eff = (v32 * scale).astype(compute_dtype)                        # (C, H)
    b2 = b.astype(jnp.float32).reshape(num_classes, 1)                 # (C, 1)

    x_item = jnp.dtype(x2.dtype).itemsize
    w_item = jnp.dtype(compute_dtype).itemsize
    out_item = jnp.dtype(out_dtype).itemsize

    # ---- Row-tile sizing: by bytes, per generation ------------------------------------
    vmem_cap = _vmem_capacity_bytes()          # 64 MiB/TC on v7x, 128 MiB on v5e/v6e
    x_tile_budget = vmem_cap // 8              # ~8 MiB (v7x) / ~16 MiB (v5e/v6e) per x tile
    rows_cap = max(128, (x_tile_budget // max(1, hidden * x_item)) // 128 * 128)
    # v7x megacore: ensure >= 2 row blocks whenever there is enough work for 2 cores.
    half_rows = _round_up(max(1, -(-n_rows // 2)), 128)
    tn = max(128, min(rows_cap, half_rows))
    num_blocks = pl.cdiv(n_rows, tn)           # ragged tail: masked by Pallas, no padding

    est_vmem = (3 * tn * hidden * x_item                # x tiles (<= 3 buffers)
                + 2 * num_classes * tn * out_item       # output tiles
                + 2 * num_classes * hidden * w_item     # folded weight (resident)
                + 2 * num_classes * 4)                  # bias
    vmem_limit = int(min(max(2 * est_vmem, 16 << 20), (3 * vmem_cap) // 4))
    vmem_limit = int(min(max(vmem_limit, est_vmem + (2 << 20)), vmem_cap))

    cost = pl.CostEstimate(
        flops=2 * n_rows * hidden * num_classes,
        transcendentals=0,
        bytes_accessed=(n_rows * hidden * x_item            # x, native dtype, unpadded
                        + num_classes * n_rows * out_item   # y
                        + num_classes * hidden * w_item),   # weights
    )

    def _run(deep_pipeline):
        if deep_pipeline and hasattr(pl, "Buffered"):
            x_spec = pl.BlockSpec((tn, hidden), lambda i: (i, 0),
                                  pipeline_mode=pl.Buffered(3))
        else:
            x_spec = pl.BlockSpec((tn, hidden), lambda i: (i, 0))
        return pl.pallas_call(
            _prediction_kernel,
            out_shape=jax.ShapeDtypeStruct((num_classes, n_rows), out_dtype),
            grid=(num_blocks,),
            in_specs=[
                x_spec,                                                  # x row tile
                pl.BlockSpec((num_classes, hidden), lambda i: (0, 0)),   # w (stays resident)
                pl.BlockSpec((num_classes, 1), lambda i: (0, 0)),        # bias (resident)
            ],
            out_specs=pl.BlockSpec((num_classes, tn), lambda i: (0, i)),
            compiler_params=pltpu.CompilerParams(
                dimension_semantics=("parallel",),
                vmem_limit_bytes=vmem_limit,
            ),
            cost_estimate=cost,
        )(x2, w_eff, b2)

    try:
        out_t = _run(deep_pipeline=num_blocks > 2)   # 3-deep x pipeline when it can help
    except Exception:
        out_t = _run(deep_pipeline=False)            # safe fallback: default double-buffer

    y = out_t.T                                      # (N, C); C=4 -> tiny transpose
    return y.reshape(*orig_shape[:-1], num_classes)


def init_prediction_params(key, hidden_size, num_classes=4):
    """Mirror the PyTorch module init: weight ~ N(0, sqrt(1/hidden)); bias = 0;
    weight_norm(dim=0): v = weight, g = per-output-row L2 norm of weight."""
    std = math.sqrt(1.0 / hidden_size)
    v = std * jax.random.normal(key, (num_classes, hidden_size), dtype=jnp.float32)
    g = jnp.sqrt(jnp.sum(v * v, axis=1))             # (C,)
    b = jnp.zeros((num_classes,), dtype=jnp.float32)
    return v, g, b


def reference_forward(x, v, g, b):
    # Pure-JAX reference (identical math) for a sanity check.
    w = v * (g[:, None] * lax.rsqrt(jnp.sum(v * v, axis=1, keepdims=True)))
    return jnp.einsum("...h,ch->...c", x, w) + b


if __name__ == "__main__":
    # TODO(synk): Dropout(p=0.2) is identity at inference time and is omitted here.
    batch, seq, hidden, num_classes = 2, 8, 32, 4

    key = jax.random.PRNGKey(0)
    k_x, k_w = jax.random.split(key)
    x = jax.random.normal(k_x, (batch, seq, hidden), dtype=jnp.float32)
    v, g, b = init_prediction_params(k_w, hidden, num_classes)
    # Perturb g / b so the weight-norm scale and bias paths are exercised non-trivially
    # (the PyTorch-faithful init makes g / ||v|| == 1 exactly).
    g = g * (0.5 + 0.25 * jnp.arange(num_classes, dtype=jnp.float32))
    b = b + 0.1 * jnp.arange(num_classes, dtype=jnp.float32)

    ref = reference_forward(x, v, g, b)

    # Native-f32 path: x streamed untouched through the kernel -> tight tolerance.
    out_f32 = jax.block_until_ready(prediction_forward(x, v, g, b))
    assert out_f32.shape == (batch, seq, num_classes)
    assert jnp.allclose(out_f32, ref, atol=1e-5, rtol=1e-5)

    # bf16-activation path (as produced by an upstream bf16 model): loose tolerance.
    x_bf16 = x.astype(jnp.bfloat16)
    out_bf16 = jax.block_until_ready(prediction_forward(x_bf16, v, g, b))
    assert out_bf16.shape == (batch, seq, num_classes)
    assert jnp.allclose(out_bf16.astype(jnp.float32), ref, atol=3e-2, rtol=3e-2)

    # Row count that is not a multiple of 128 exercises the ragged-tail (no-pad) path.
    x_odd = jax.random.normal(k_x, (3, 5, hidden), dtype=jnp.float32)
    ref_odd = reference_forward(x_odd, v, g, b)
    out_odd = jax.block_until_ready(prediction_forward(x_odd, v, g, b))
    assert out_odd.shape == (3, 5, num_classes)
    assert jnp.allclose(out_odd, ref_odd, atol=1e-5, rtol=1e-5)

    print("KERNEL_OK")
</pallas_src>

<mosaic_0001>
module attributes {stable_mosaic.version = 11 : i64} {
  func.func @_prediction_kernel(%arg0: i32, %arg1: memref<128x32xf32, #tpu.memory_space<vmem>>, %arg2: memref<4x32xf32, #tpu.memory_space<vmem>>, %arg3: memref<4x1xf32, #tpu.memory_space<vmem>>, %arg4: memref<4x128xf32, #tpu.memory_space<vmem>>) attributes {dimension_semantics = [#tpu.dimension_semantics<parallel>], iteration_bounds = array<i64: 1>, scalar_prefetch = 0 : i64, scratch_operands = 0 : i64, tpu.core_type = #tpu.core_type<tc>, window_params = [{transform_indices = @transform_0, window_bounds = array<i64: 128, 32>}, {pipeline_mode = #tpu.pipeline_mode<synchronous>, transform_indices = @transform_1, window_bounds = array<i64: 4, 32>}, {pipeline_mode = #tpu.pipeline_mode<synchronous>, transform_indices = @transform_2, window_bounds = array<i64: 4, 1>}, {transform_indices = @transform_3, window_bounds = array<i64: 4, 128>}]} {
    %c0 = arith.constant 0 : index
    %c0_0 = arith.constant 0 : index
    %0 = vector.load %arg1[%c0, %c0_0] : memref<128x32xf32, #tpu.memory_space<vmem>>, vector<128x32xf32>
    %c0_1 = arith.constant 0 : index
    %c0_2 = arith.constant 0 : index
    %1 = vector.load %arg2[%c0_1, %c0_2] : memref<4x32xf32, #tpu.memory_space<vmem>>, vector<4x32xf32>
    %cst = arith.constant dense<0.000000e+00> : vector<4x128xf32>
    %2 = tpu.matmul %1, %0, %cst {dimension_numbers = #tpu.dot_dimension_numbers<[1], [1], [0], [0], [0, 0, 1, 0], [], []>} : vector<4x32xf32>, vector<128x32xf32>, vector<4x128xf32> -> vector<4x128xf32>
    %c0_3 = arith.constant 0 : index
    %c0_4 = arith.constant 0 : index
    %3 = vector.load %arg3[%c0_3, %c0_4] : memref<4x1xf32, #tpu.memory_space<vmem>>, vector<4x1xf32>
    %4 = vector.broadcast %3 : vector<4x1xf32> to vector<4x128xf32>
    %5 = arith.addf %2, %4 : vector<4x128xf32>
    %c0_5 = arith.constant 0 : index
    %c0_6 = arith.constant 0 : index
    %6 = vector.load %arg4[%c0_5, %c0_6] : memref<4x128xf32, #tpu.memory_space<vmem>>, vector<4x128xf32>
    tpu.vector_store %arg4[%c0_5, %c0_6], %5 {strides = array<i32>} : memref<4x128xf32, #tpu.memory_space<vmem>>, vector<4x128xf32>,
    return
  }
  func.func @transform_0(%arg0: i32) -> (i32, i32) {
    %c0_i32 = arith.constant 0 : i32
    %c0_i32_0 = arith.constant 0 : i32
    return %arg0, %c0_i32 : i32, i32
  }
  func.func @transform_1(%arg0: i32) -> (i32, i32) {
    %c0_i32 = arith.constant 0 : i32
    %c0_i32_0 = arith.constant 0 : i32
    %c0_i32_1 = arith.constant 0 : i32
    return %c0_i32, %c0_i32_0 : i32, i32
  }
  func.func @transform_2(%arg0: i32) -> (i32, i32) {
    %c0_i32 = arith.constant 0 : i32
    %c0_i32_0 = arith.constant 0 : i32
    %c0_i32_1 = arith.constant 0 : i32
    return %c0_i32, %c0_i32_0 : i32, i32
  }
  func.func @transform_3(%arg0: i32) -> (i32, i32) {
    %c0_i32 = arith.constant 0 : i32
    %c0_i32_0 = arith.constant 0 : i32
    return %c0_i32, %arg0 : i32, i32
  }
}

module attributes {stable_mosaic.version = 11 : i64} {
  func.func @_prediction_kernel(%arg0: i32, %arg1: memref<128x32xf32, #tpu.memory_space<vmem>>, %arg2: memref<4x32xf32, #tpu.memory_space<vmem>>, %arg3: memref<4x1xf32, #tpu.memory_space<vmem>>, %arg4: memref<4x128xf32, #tpu.memory_space<vmem>>) attributes {dimension_semantics = [#tpu.dimension_semantics<parallel>], iteration_bounds = array<i64: 1>, scalar_prefetch = 0 : i64, scratch_operands = 0 : i64, tpu.core_type = #tpu.core_type<tc>, window_params = [{transform_indices = @transform_0, window_bounds = array<i64: 128, 32>}, {pipeline_mode = #tpu.pipeline_mode<synchronous>, transform_indices = @transform_1, window_bounds = array<i64: 4, 32>}, {pipeline_mode = #tpu.pipeline_mode<synchronous>, transform_indices = @transform_2, window_bounds = array<i64: 4, 1>}, {transform_indices = @transform_3, window_bounds = array<i64: 4, 128>}]} {
    %c0 = arith.constant 0 : index
    %c0_0 = arith.constant 0 : index
    %0 = vector.load %arg1[%c0, %c0_0] : memref<128x32xf32, #tpu.memory_space<vmem>>, vector<128x32xf32>
    %c0_1 = arith.constant 0 : index
    %c0_2 = arith.constant 0 : index
    %1 = vector.load %arg2[%c0_1, %c0_2] : memref<4x32xf32, #tpu.memory_space<vmem>>, vector<4x32xf32>
    %cst = arith.constant dense<0.000000e+00> : vector<4x128xf32>
    %2 = tpu.matmul %1, %0, %cst {dimension_numbers = #tpu.dot_dimension_numbers<[1], [1], [0], [0], [0, 0, 1, 0], [], []>} : vector<4x32xf32>, vector<128x32xf32>, vector<4x128xf32> -> vector<4x128xf32>
    %c0_3 = arith.constant 0 : index
    %c0_4 = arith.constant 0 : index
    %3 = vector.load %arg3[%c0_3, %c0_4] : memref<4x1xf32, #tpu.memory_space<vmem>>, vector<4x1xf32>
    %4 = vector.broadcast %3 : vector<4x1xf32> to vector<4x128xf32>
    %5 = arith.addf %2, %4 : vector<4x128xf32>
    %c0_5 = arith.constant 0 : index
    %c0_6 = arith.constant 0 : index
    %6 = vector.load %arg4[%c0_5, %c0_6] : memref<4x128xf32, #tpu.memory_space<vmem>>, vector<4x128xf32>
    tpu.vector_store %arg4[%c0_5, %c0_6], %5 {strides = array<i32>} : memref<4x128xf32, #tpu.memory_space<vmem>>, vector<4x128xf32>,
    return
  }
  func.func @transform_0(%arg0: i32) -> (i32, i32) {
    %c0_i32 = arith.constant 0 : i32
    %c0_i32_0 = arith.constant 0 : i32
    return %arg0, %c0_i32 : i32, i32
  }
  func.func @transform_1(%arg0: i32) -> (i32, i32) {
    %c0_i32 = arith.constant 0 : i32
    %c0_i32_0 = arith.constant 0 : i32
    %c0_i32_1 = arith.constant 0 : i32
    return %c0_i32, %c0_i32_0 : i32, i32
  }
  func.func @transform_2(%arg0: i32) -> (i32, i32) {
    %c0_i32 = arith.constant 0 : i32
    %c0_i32_0 = arith.constant 0 : i32
    %c0_i32_1 = arith.constant 0 : i32
    return %c0_i32, %c0_i32_0 : i32, i32
  }
  func.func @transform_3(%arg0: i32) -> (i32, i32) {
    %c0_i32 = arith.constant 0 : i32
    %c0_i32_0 = arith.constant 0 : i32
    return %c0_i32, %arg0 : i32, i32
  }
}

</mosaic_0001>

<bundles_post_ra>
// kernel: tpu_custom_call.1
= control target key start
LH: loop header
LB: loop body
LE: loop exit
PB: predicated region body
PF: predicated region fallthrough
CT: control target
= control target key end

     0   :  { %8 = vsyncpa [#allocation3], 0  ;;  %s429_s0 = inlined_call_operand.hbm [shape: f32[16,32], index: 0, kind: input, shape index: {}]   ;;  %s430_s1 = inlined_call_operand.vmem [shape: f32[4,32], index: 1, kind: input, shape index: {}]   ;;  %s431_s2 = inlined_call_operand.vmem [shape: f32[4,1], index: 2, kind: input, shape index: {}]   ;;  %s432_s3 = inlined_call_operand.hbm [shape: f32[4,16], index: 3, kind: output, shape index: {}]  }
   0x1   :  { %9 = vsyncpa [#allocation4], 0 }
   0x2   :  { %14 = vsyncadd [#allocation3], 1792  ;;  %s348_s12 = smov [#allocation2]   ;;  %s300_s16 = scalar_lea.hbm %s429_s0, 256 }
   0x3   :  { %s15_s13 = sshll.u32 %s348_s12, 4  ;;  %p301_p0 = scmp.ne.s32.totalorder %s429_s0, %s300_s16  ;;  %s16_s13 = int_to_ptr.vmem [resolvable:$true] %s15_s13 }
   0x4   :  { %p304_p1 = scmp.lt.u32.totalorder %s300_s16, %s429_s0 }
   0x6   :  { %p306_p2 = pnand %p304_p1, %p301_p0 }
   0x8   :  { %309 = shalt.err (!%p306_p2)
}
   0x9   :  { %s310_s21 = scalar_lea.vmem %s16_s13, 256  ;;  %s314_s22 = scalar_lea.vmem %s16_s13, 2048 }
   0xa   :  { %p311_p3 = scmp.ne.s32.totalorder %s16_s13, %s310_s21  ;;  %p315_p4 = scmp.lt.s32.totalorder %s16_s13, %s16_s13 }
   0xb   :  { %p316_p5 = scmp.lt.s32.totalorder %s314_s22, %s310_s21 }
   0xd   :  { %p317_p6 = por %p316_p5, %p315_p4 }
   0xf   :  { %p318_p7 = pnand %p317_p6, %p311_p3 }
  0x11   :  { %321 = shalt.err (!%p318_p7)
}
  0x12   :  { %s349_s23 = smov 128   ;;  %s350_s24 = smov 8  }
  0x13   :  { %21 = dma.hbm_to_vmem [thread:$0]  %s429_s0, 256, %s16_s13, [#allocation3], %s349_s23, %s349_s23, %s350_s24  }
  0x14   :  { %344 = dma.done.wait [#allocation3], 2048  }
  0x15   :  { %345 = vsyncadd [#allocation3], 4294965248  ;;  %v351_v0 = vmov 0.0|0.0   ;;  %vm352_vm0 = vmmov 0   ;;  %v353_v1 = vmov 0.0   ;;  %v354_v2 = vmov 0  }
  0x16   :  { %259 = vmatprep.subr.bf16.mxu0 %v351_v0  ;;  %256 = vmatprep.mubr.msk.f32.mxu0 %vm352_vm0, %v353_v1  ;;  %vm52_vm1 = vcmask 261120   ;;  %v29_v3 = vld [vmem:[#allocation2] sm:$0xff]  ;;  %v30_v4 = vld [vmem:[#allocation2 + $0x8] sm:$0xff]  ;;  %v31_v7 = vld [vmem:[#allocation2 + $0x10] sm:$0xff]  ;;  %s355_s29 = smov [#allocation5]  }
  0x17   :  { %299 = vset.pattern.permute.xlu0 %v354_v2  ;;  %vm390_vm2 = vmpackc.low %vm52_vm1, %vm52_vm1  ;;  %v260_v6 = vpack.c.bf16 %v30_v4, %v29_v3  ;;  %v32_v8 = vld [vmem:[#allocation2 + $0x18] sm:$0xff]  ;;  %v46_v9 = vld [vmem:[%s431_s2] sm:$0xf]  ;;  %s181_s30 = sshll.u32 %s355_s29, 4  ;;  %s182_s30 = int_to_ptr.vmem [resolvable:$true] %s181_s30 }
  0x18   :  { %49 = vperm.xlu0 %299, %v46_v9   ;;  %v264_v10 = vpack.c.bf16 %v32_v8, %v31_v7  ;;  %v33_v11 = vld [vmem:[#allocation2 + $0x20] sm:$0xff]  ;;  %v34_v12 = vld [vmem:[#allocation2 + $0x28] sm:$0xff]  ;;  %v35_v14 = vld [vmem:[#allocation2 + $0x30] sm:$0xff]  ;;  %s322_s4 = scalar_lea.vmem %s182_s30, 64  ;;  %p327_p9 = scmp.lt.s32.totalorder %s182_s30, %s182_s30 }
  0x19   :  { %262 = vmatpush3.bf16.xpose.msk.msra.mxu0 %vm390_vm2, %v260_v6  ;;  %v268_v13 = vpack.c.bf16 %v34_v12, %v33_v11  ;;  %v36_v15 = vld [vmem:[#allocation2 + $0x38] sm:$0xff]  ;;  %v37_v17 = vld [vmem:[#allocation2 + $0x40] sm:$0xff]  ;;  %v38_v18 = vld [vmem:[#allocation2 + $0x48] sm:$0xff]  ;;  %p323_p8 = scmp.ne.s32.totalorder %s182_s30, %s322_s4  ;;  %p328_p10 = scmp.lt.s32.totalorder %s322_s4, %s322_s4 }
  0x1a   :  { %263 = vmatprep.subr.bf16.mxu0 %v351_v0  ;;  %v272_v16 = vpack.c.bf16 %v36_v15, %v35_v14  ;;  %v276_v19 = vpack.c.bf16 %v38_v18, %v37_v17  ;;  %v39_v20 = vld [vmem:[#allocation2 + $0x50] sm:$0xff]  ;;  %v40_v21 = vld [vmem:[#allocation2 + $0x58] sm:$0xff]  ;;  %v41_v23 = vld [vmem:[#allocation2 + $0x60] sm:$0xff] }
  0x1b   :  { %v280_v22 = vpack.c.bf16 %v40_v21, %v39_v20  ;;  %v42_v24 = vld [vmem:[#allocation2 + $0x68] sm:$0xff]  ;;  %v43_v26 = vld [vmem:[#allocation2 + $0x70] sm:$0xff]  ;;  %v44_v27 = vld [vmem:[#allocation2 + $0x78] sm:$0xff]  ;;  %p329_p11 = por %p328_p10, %p327_p9 }
  0x1c   :  { %v284_v25 = vpack.c.bf16 %v42_v24, %v41_v23  ;;  %v288_v28 = vpack.c.bf16 %v44_v27, %v43_v26  ;;  %v45_v29 = vld [vmem:[%s430_s1] sm:$0xf] }
  0x1d   :  { %p330_p12 = pnand %p329_p11, %p323_p8 }
  0x21   :  { %266 = vmatpush3.bf16.xpose.msk.msra.mxu0 %vm390_vm2, %v264_v10 }
  0x22   :  { %267 = vmatprep.subr.bf16.mxu0 %v351_v0 }
  0x29   :  { %270 = vmatpush3.bf16.xpose.msk.msra.mxu0 %vm390_vm2, %v268_v13 }
  0x2a   :  { %271 = vmatprep.subr.bf16.mxu0 %v351_v0 }
  0x31   :  { %274 = vmatpush3.bf16.xpose.msk.msra.mxu0 %vm390_vm2, %v272_v16 }
  0x32   :  { %275 = vmatprep.subr.bf16.mxu0 %v351_v0 }
  0x39   :  { %278 = vmatpush3.bf16.xpose.msk.msra.mxu0 %vm390_vm2, %v276_v19 }
  0x3a   :  { %279 = vmatprep.subr.bf16.mxu0 %v351_v0 }
  0x41   :  { %282 = vmatpush3.bf16.xpose.msk.msra.mxu0 %vm390_vm2, %v280_v22 }
  0x42   :  { %283 = vmatprep.subr.bf16.mxu0 %v351_v0 }
  0x49   :  { %286 = vmatpush3.bf16.xpose.msk.msra.mxu0 %vm390_vm2, %v284_v25 }
  0x4a   :  { %287 = vmatprep.subr.bf16.mxu0 %v351_v0 }
  0x51   :  { %290 = vmatpush3.bf16.xpose.msk.msra.mxu0 %vm390_vm2, %v288_v28 }
  0x58   :  { %257 = vmatmul.mubr.msk.f32.vlgmr.msra.gmra.mrb[0].mxu0 %vm52_vm1, %v45_v29 }
  0x97   :  { %v50_v30 = vpop.permute.xlu0 %49 }
 0x12b   :  { %v170_v31 = vpop.f32.mrb[0].mxu0 }
 0x12c   :  { %v171_v32 = vadd.f32 %v170_v31, %v50_v30  ;;  %v258_v33 = vpop.f32.mrb[1].mxu0 }
 0x12e   :  { %174 = vst [vmem:[#allocation5] sm:$0xf] %v171_v32 }
 0x12f   :  { %333 = shalt.err (!%p330_p12)
}
 0x130   :  { %s334_s1 = scalar_lea.hbm %s432_s3, 64 }
 0x131   :  { %p335_p13 = scmp.ne.s32.totalorder %s432_s3, %s334_s1  ;;  %p338_p0 = scmp.lt.u32.totalorder %s334_s1, %s432_s3 }
 0x133   :  { %p340_p1 = pnand %p338_p0, %p335_p13 }
 0x135   :  { %343 = shalt.err (!%p340_p1)
}
 0x136   :  { %184 = dma.vmem_to_hbm [thread:$0]  %s182_s30, 64, %s432_s3, [#allocation4]  }
 0x137   :  { %346 = dma.done.wait [#allocation4], 64  }
 0x138   :  { %347 = vsyncadd [#allocation4], 4294967232 }
 0x139   :  { %188 = vsyncpa [#allocation3], 1 }
 0x13a   :  { %189 = vsyncpa [#allocation4], 1 }

// kernel: tpu_custom_call.1
= control target key start
LH: loop header
LB: loop body
LE: loop exit
PB: predicated region body
PF: predicated region fallthrough
CT: control target
= control target key end

     0   :  { %8 = vsyncpa [#allocation3], 0  ;;  %s429_s0 = inlined_call_operand.hbm [shape: f32[16,32], index: 0, kind: input, shape index: {}]   ;;  %s430_s1 = inlined_call_operand.vmem [shape: f32[4,32], index: 1, kind: input, shape index: {}]   ;;  %s431_s2 = inlined_call_operand.vmem [shape: f32[4,1], index: 2, kind: input, shape index: {}]   ;;  %s432_s3 = inlined_call_operand.hbm [shape: f32[4,16], index: 3, kind: output, shape index: {}]  }
   0x1   :  { %9 = vsyncpa [#allocation4], 0 }
   0x2   :  { %14 = vsyncadd [#allocation3], 1792  ;;  %s348_s12 = smov [#allocation2]   ;;  %s300_s16 = scalar_lea.hbm %s429_s0, 256 }
   0x3   :  { %s15_s13 = sshll.u32 %s348_s12, 4  ;;  %p301_p0 = scmp.ne.s32.totalorder %s429_s0, %s300_s16  ;;  %s16_s13 = int_to_ptr.vmem [resolvable:$true] %s15_s13 }
   0x4   :  { %p304_p1 = scmp.lt.u32.totalorder %s300_s16, %s429_s0 }
   0x6   :  { %p306_p2 = pnand %p304_p1, %p301_p0 }
   0x8   :  { %309 = shalt.err (!%p306_p2)
}
   0x9   :  { %s310_s21 = scalar_lea.vmem %s16_s13, 256  ;;  %s314_s22 = scalar_lea.vmem %s16_s13, 2048 }
   0xa   :  { %p311_p3 = scmp.ne.s32.totalorder %s16_s13, %s310_s21  ;;  %p315_p4 = scmp.lt.s32.totalorder %s16_s13, %s16_s13 }
   0xb   :  { %p316_p5 = scmp.lt.s32.totalorder %s314_s22, %s310_s21 }
   0xd   :  { %p317_p6 = por %p316_p5, %p315_p4 }
   0xf   :  { %p318_p7 = pnand %p317_p6, %p311_p3 }
  0x11   :  { %321 = shalt.err (!%p318_p7)
}
  0x12   :  { %s349_s23 = smov 128   ;;  %s350_s24 = smov 8  }
  0x13   :  { %21 = dma.hbm_to_vmem [thread:$0]  %s429_s0, 256, %s16_s13, [#allocation3], %s349_s23, %s349_s23, %s350_s24  }
  0x14   :  { %344 = dma.done.wait [#allocation3], 2048  }
  0x15   :  { %345 = vsyncadd [#allocation3], 4294965248  ;;  %v351_v0 = vmov 0.0|0.0   ;;  %vm352_vm0 = vmmov 0   ;;  %v353_v1 = vmov 0.0   ;;  %v354_v2 = vmov 0  }
  0x16   :  { %259 = vmatprep.subr.bf16.mxu0 %v351_v0  ;;  %256 = vmatprep.mubr.msk.f32.mxu0 %vm352_vm0, %v353_v1  ;;  %vm52_vm1 = vcmask 261120   ;;  %v29_v3 = vld [vmem:[#allocation2] sm:$0xff]  ;;  %v30_v4 = vld [vmem:[#allocation2 + $0x8] sm:$0xff]  ;;  %v31_v7 = vld [vmem:[#allocation2 + $0x10] sm:$0xff]  ;;  %s355_s29 = smov [#allocation5]  }
  0x17   :  { %299 = vset.pattern.permute.xlu0 %v354_v2  ;;  %vm390_vm2 = vmpackc.low %vm52_vm1, %vm52_vm1  ;;  %v260_v6 = vpack.c.bf16 %v30_v4, %v29_v3  ;;  %v32_v8 = vld [vmem:[#allocation2 + $0x18] sm:$0xff]  ;;  %v46_v9 = vld [vmem:[%s431_s2] sm:$0xf]  ;;  %s181_s30 = sshll.u32 %s355_s29, 4  ;;  %s182_s30 = int_to_ptr.vmem [resolvable:$true] %s181_s30 }
  0x18   :  { %49 = vperm.xlu0 %299, %v46_v9   ;;  %v264_v10 = vpack.c.bf16 %v32_v8, %v31_v7  ;;  %v33_v11 = vld [vmem:[#allocation2 + $0x20] sm:$0xff]  ;;  %v34_v12 = vld [vmem:[#allocation2 + $0x28] sm:$0xff]  ;;  %v35_v14 = vld [vmem:[#allocation2 + $0x30] sm:$0xff]  ;;  %s322_s4 = scalar_lea.vmem %s182_s30, 64  ;;  %p327_p9 = scmp.lt.s32.totalorder %s182_s30, %s182_s30 }
  0x19   :  { %262 = vmatpush3.bf16.xpose.msk.msra.mxu0 %vm390_vm2, %v260_v6  ;;  %v268_v13 = vpack.c.bf16 %v34_v12, %v33_v11  ;;  %v36_v15 = vld [vmem:[#allocation2 + $0x38] sm:$0xff]  ;;  %v37_v17 = vld [vmem:[#allocation2 + $0x40] sm:$0xff]  ;;  %v38_v18 = vld [vmem:[#allocation2 + $0x48] sm:$0xff]  ;;  %p323_p8 = scmp.ne.s32.totalorder %s182_s30, %s322_s4  ;;  %p328_p10 = scmp.lt.s32.totalorder %s322_s4, %s322_s4 }
  0x1a   :  { %263 = vmatprep.subr.bf16.mxu0 %v351_v0  ;;  %v272_v16 = vpack.c.bf16 %v36_v15, %v35_v14  ;;  %v276_v19 = vpack.c.bf16 %v38_v18, %v37_v17  ;;  %v39_v20 = vld [vmem:[#allocation2 + $0x50] sm:$0xff]  ;;  %v40_v21 = vld [vmem:[#allocation2 + $0x58] sm:$0xff]  ;;  %v41_v23 = vld [vmem:[#allocation2 + $0x60] sm:$0xff] }
  0x1b   :  { %v280_v22 = vpack.c.bf16 %v40_v21, %v39_v20  ;;  %v42_v24 = vld [vmem:[#allocation2 + $0x68] sm:$0xff]  ;;  %v43_v26 = vld [vmem:[#allocation2 + $0x70] sm:$0xff]  ;;  %v44_v27 = vld [vmem:[#allocation2 + $0x78] sm:$0xff]  ;;  %p329_p11 = por %p328_p10, %p327_p9 }
  0x1c   :  { %v284_v25 = vpack.c.bf16 %v42_v24, %v41_v23  ;;  %v288_v28 = vpack.c.bf16 %v44_v27, %v43_v26  ;;  %v45_v29 = vld [vmem:[%s430_s1] sm:$0xf] }
  0x1d   :  { %p330_p12 = pnand %p329_p11, %p323_p8 }
  0x21   :  { %266 = vmatpush3.bf16.xpose.msk.msra.mxu0 %vm390_vm2, %v264_v10 }
  0x22   :  { %267 = vmatprep.subr.bf16.mxu0 %v351_v0 }
  0x29   :  { %270 = vmatpush3.bf16.xpose.msk.msra.mxu0 %vm390_vm2, %v268_v13 }
  0x2a   :  { %271 = vmatprep.subr.bf16.mxu0 %v351_v0 }
  0x31   :  { %274 = vmatpush3.bf16.xpose.msk.msra.mxu0 %vm390_vm2, %v272_v16 }
  0x32   :  { %275 = vmatprep.subr.bf16.mxu0 %v351_v0 }
  0x39   :  { %278 = vmatpush3.bf16.xpose.msk.msra.mxu0 %vm390_vm2, %v276_v19 }
  0x3a   :  { %279 = vmatprep.subr.bf16.mxu0 %v351_v0 }
  0x41   :  { %282 = vmatpush3.bf16.xpose.msk.msra.mxu0 %vm390_vm2, %v280_v22 }
  0x42   :  { %283 = vmatprep.subr.bf16.mxu0 %v351_v0 }
  0x49   :  { %286 = vmatpush3.bf16.xpose.msk.msra.mxu0 %vm390_vm2, %v284_v25 }
  0x4a   :  { %287 = vmatprep.subr.bf16.mxu0 %v351_v0 }
  0x51   :  { %290 = vmatpush3.bf16.xpose.msk.msra.mxu0 %vm390_vm2, %v288_v28 }
  0x58   :  { %257 = vmatmul.mubr.msk.f32.vlgmr.msra.gmra.mrb[0].mxu0 %vm52_vm1, %v45_v29 }
  0x97   :  { %v50_v30 = vpop.permute.xlu0 %49 }
 0x12b   :  { %v170_v31 = vpop.f32.mrb[0].mxu0 }
 0x12c   :  { %v171_v32 = vadd.f32 %v170_v31, %v50_v30  ;;  %v258_v33 = vpop.f32.mrb[1].mxu0 }
 0x12e   :  { %174 = vst [vmem:[#allocation5] sm:$0xf] %v171_v32 }
 0x12f   :  { %333 = shalt.err (!%p330_p12)
}
 0x130   :  { %s334_s1 = scalar_lea.hbm %s432_s3, 64 }
 0x131   :  { %p335_p13 = scmp.ne.s32.totalorder %s432_s3, %s334_s1  ;;  %p338_p0 = scmp.lt.u32.totalorder %s334_s1, %s432_s3 }
 0x133   :  { %p340_p1 = pnand %p338_p0, %p335_p13 }
 0x135   :  { %343 = shalt.err (!%p340_p1)
}
 0x136   :  { %184 = dma.vmem_to_hbm [thread:$0]  %s182_s30, 64, %s432_s3, [#allocation4]  }
 0x137   :  { %346 = dma.done.wait [#allocation4], 64  }
 0x138   :  { %347 = vsyncadd [#allocation4], 4294967232 }
 0x139   :  { %188 = vsyncpa [#allocation3], 1 }
 0x13a   :  { %189 = vsyncpa [#allocation4], 1 }

</bundles_post_ra>
